<compile_context>
chip_gen: v7x
topology: tpu7x:2x2x1
jax: 0.10.0
libtpu: 0.0.40
codegen_flags: <defaults>
</compile_context>

<pallas_src>
import functools

import jax
import jax.numpy as jnp
from jax.experimental import pallas as pl
from jax.experimental.pallas import tpu as pltpu


def _round_up(x, m):
    return ((x + m - 1) // m) * m


def _tpu_kind():
    try:
        return jax.devices()[0].device_kind.lower()
    except Exception:
        return ""


def _pick_group(state_dim, hidden_max):
    """Lane-packing factor G (batch rows packed into the lane dimension).

    Chosen so that (a) the packed input width G*state_dim approaches one full
    128-lane vreg and (b) the layer-2 contraction K = G*hidden fits one MXU
    pass (128-wide on v2-v5, 256-wide on v6e/v7x)."""
    kind = _tpu_kind()
    narrow_mxu = any(t in kind for t in ("v2", "v3", "v4", "v5"))
    k_cap = 128 if narrow_mxu else 256
    g_lane = max(1, 128 // max(1, state_dim))
    g_k = max(1, k_cap // max(1, hidden_max))
    return max(1, min(g_lane, g_k))


def _has_two_tensorcores():
    kind = _tpu_kind()
    return any(t in kind for t in ("v4", "v5p", "v7", "7x"))


_MAX_PACKED_TILE = 1024   # packed rows per grid step (= 8192 original rows at G=8)


def _pick_batch_tile(rows):
    """Batch tile in PACKED rows (each packed row holds G original rows)."""
    if not _has_two_tensorcores():
        # Single TensorCore (v5e/v6e): one step when it fits (no pointless
        # split), otherwise big tiles to amortize the ~0.35us/step overhead.
        return rows if rows <= _MAX_PACKED_TILE else _MAX_PACKED_TILE
    # Two TensorCores (v7x / v4 / v5p megacore): >=2 steps so the 'parallel'
    # batch axis splits across cores; tiles are multiples of 16 sublanes.
    if rows <= 32:
        return rows                      # too small to be worth splitting
    if rows <= 2 * _MAX_PACKED_TILE:
        return _round_up(pl.cdiv(rows, 2), 16)
    return _MAX_PACKED_TILE


# ---------------------------------------------------------------------------
# Pallas kernel: the whole 3-layer MLP on one lane-packed batch tile.
#   x_ref : (bt, G*S)   f32   (cast to compute_dtype inside the kernel)
#   w*_ref: block-diagonal kron(I_G, W) slabs, compute_dtype (bf16)
#   b*_ref: (1, G*out)  f32   (bias tiled G times)
#   o_ref : (bt, G*A)   f32
# ---------------------------------------------------------------------------
def _qnet_kernel(x_ref, w1_ref, w2_ref, w3_ref, b1_ref, b2_ref, b3_ref, o_ref,
                 *, compute_dtype):
    f32 = jnp.float32
    x = x_ref[...].astype(compute_dtype)           # in-kernel cast: free VPU op

    h = jnp.dot(x, w1_ref[...], preferred_element_type=f32)        # (bt, G*H0)
    h = jnp.maximum(h + b1_ref[...], 0.0).astype(compute_dtype)

    h = jnp.dot(h, w2_ref[...], preferred_element_type=f32)        # (bt, G*H1)
    h = jnp.maximum(h + b2_ref[...], 0.0).astype(compute_dtype)

    q = jnp.dot(h, w3_ref[...], preferred_element_type=f32)        # (bt, G*A)
    o_ref[...] = (q + b3_ref[...]).astype(o_ref.dtype)


# ---------------------------------------------------------------------------
# Parameter packing: block-diagonal weight slabs (kron) + G-tiled biases.
# Cheap and one-time; hoist out of the training step if called repeatedly.
# ---------------------------------------------------------------------------
def pack_qnet_params(params, group, compute_dtype=jnp.bfloat16):
    G = int(group)
    eye = jnp.eye(G, dtype=jnp.float32)

    def block_diag(w):                   # (in, out) -> (G*in, G*out)
        return jnp.kron(eye, w.astype(jnp.float32)).astype(compute_dtype)

    def tile_bias(b):                    # (1, out) -> (1, G*out), f32
        return jnp.tile(b.reshape(1, -1).astype(jnp.float32), (1, G))

    return (block_diag(params["w1"]), block_diag(params["w2"]),
            block_diag(params["w3"]),
            tile_bias(params["b1"]), tile_bias(params["b2"]),
            tile_bias(params["b3"]))


# ---------------------------------------------------------------------------
# Wrapper
# ---------------------------------------------------------------------------
def qnet_forward(state, params, *, group=None, batch_tile=None,
                 compute_dtype=jnp.bfloat16):
    """QNet forward. state: (B, state_dim) f32. params: dict of (in,out) weights."""
    B, S = state.shape
    assert params["w1"].shape[0] == S
    H0 = params["w1"].shape[1]
    H1 = params["w2"].shape[1]
    A = params["w3"].shape[1]

    G = int(group) if group is not None else _pick_group(S, max(H0, H1))
    w1p, w2p, w3p, b1p, b2p, b3p = pack_qnet_params(params, G, compute_dtype)

    Bp = _round_up(B, G)
    if Bp != B:
        # Rare (B not a multiple of G): pad <=G-1 rows so the lane-packed
        # reshape below stays a plain row-major view; padded rows are sliced
        # off at the end.  No pad / no copy when B % G == 0 (the common case).
        state = jnp.pad(state, ((0, Bp - B), (0, 0)))
    rows = Bp // G
    x = state.reshape(rows, G * S)       # free row-major reshape of the view

    bt = int(batch_tile) if batch_tile is not None else _pick_batch_tile(rows)
    bt = min(bt, rows)
    grid = (pl.cdiv(rows, bt),)          # partial last block: tail rows dropped

    out = pl.pallas_call(
        functools.partial(_qnet_kernel, compute_dtype=compute_dtype),
        out_shape=jax.ShapeDtypeStruct((rows, G * A), jnp.float32),
        grid_spec=pl.GridSpec(
            grid=grid,
            in_specs=[
                pl.BlockSpec((bt, G * S), lambda i: (i, 0)),   # f32 state tile
                pl.BlockSpec(w1p.shape, lambda i: (0, 0)),     # resident params
                pl.BlockSpec(w2p.shape, lambda i: (0, 0)),
                pl.BlockSpec(w3p.shape, lambda i: (0, 0)),
                pl.BlockSpec(b1p.shape, lambda i: (0, 0)),
                pl.BlockSpec(b2p.shape, lambda i: (0, 0)),
                pl.BlockSpec(b3p.shape, lambda i: (0, 0)),
            ],
            out_specs=pl.BlockSpec((bt, G * A), lambda i: (i, 0)),
        ),
        compiler_params=pltpu.CompilerParams(
            dimension_semantics=("parallel",)),
    )(x, w1p, w2p, w3p, b1p, b2p, b3p)

    q = out.reshape(Bp, A)               # free row-major un-pack
    return q[:B] if Bp != B else q


# ---------------------------------------------------------------------------
# Deterministic parameter construction (orthogonal weights, zero biases),
# mirroring QNet.__network_init. Weights stored transposed: (in_dim, out_dim).
# ---------------------------------------------------------------------------
def _orthogonal(key, rows, cols):
    n = max(rows, cols)
    a = jax.random.normal(key, (n, n), jnp.float32)
    q, r = jnp.linalg.qr(a)
    q = q * jnp.sign(jnp.diagonal(r))[None, :]
    return q[:rows, :cols]


def make_qnet_params(key, state_dim, q_layer, action_dim):
    dims = [state_dim] + list(q_layer) + [action_dim]
    keys = jax.random.split(key, len(dims) - 1)
    params = {}
    for idx, (din, dout) in enumerate(zip(dims[:-1], dims[1:]), start=1):
        w_pt = _orthogonal(keys[idx - 1], dout, din)          # PyTorch (out, in)
        params[f"w{idx}"] = jnp.asarray(w_pt.T, jnp.float32)  # stored (in, out)
        params[f"b{idx}"] = jnp.zeros((1, dout), jnp.float32)
    return params


# Pure-JAX reference (optionally with matching bf16 casts) for correctness.
def qnet_ref(state, params, compute_dtype=jnp.float32):
    cd = compute_dtype
    f32 = jnp.float32
    h = jnp.dot(state.astype(cd), params["w1"].astype(cd),
                preferred_element_type=f32) + params["b1"]
    h = jnp.maximum(h, 0.0)
    h = jnp.dot(h.astype(cd), params["w2"].astype(cd),
                preferred_element_type=f32) + params["b2"]
    h = jnp.maximum(h, 0.0)
    return jnp.dot(h.astype(cd), params["w3"].astype(cd),
                   preferred_element_type=f32) + params["b3"]


if __name__ == "__main__":
    # QNet(state_dim=16, action_dim=4, q_layer=[32, 32], encoder=None)
    state_dim, action_dim = 16, 4
    q_layer = (32, 32)

    key = jax.random.PRNGKey(0)
    k_param, k1, k2, k3 = jax.random.split(key, 4)
    params = make_qnet_params(k_param, state_dim, q_layer, action_dim)

    def run_and_check(batch, k):
        state = jax.random.normal(k, (batch, state_dim), jnp.float32)
        q = jax.block_until_ready(qnet_forward(state, params))
        assert q.shape == (batch, action_dim)
        q_bf16 = qnet_ref(state, params, compute_dtype=jnp.bfloat16)
        q_f32 = qnet_ref(state, params, compute_dtype=jnp.float32)
        assert jnp.allclose(q, q_bf16, atol=2e-3, rtol=2e-3), \
            f"mismatch vs bf16 reference at batch={batch}"
        assert float(jnp.max(jnp.abs(q - q_f32))) < 0.2, \
            f"bf16-vs-f32 sanity bound violated at batch={batch}"

    run_and_check(8, k1)      # tiny batch: 1 packed row, single grid step
    run_and_check(300, k2)    # ragged batch (pads <=G-1 rows when B % G != 0)
    run_and_check(1000, k3)   # multi-step 'parallel' grid / partial last block

    print("KERNEL_OK")
</pallas_src>

<mosaic_0001>
module attributes {stable_mosaic.version = 11 : i64} {
  func.func @_qnet_kernel(%arg0: i32, %arg1: memref<1x128xf32, #tpu.memory_space<vmem>>, %arg2: memref<128x256xbf16, #tpu.memory_space<vmem>>, %arg3: memref<256x256xbf16, #tpu.memory_space<vmem>>, %arg4: memref<256x32xbf16, #tpu.memory_space<vmem>>, %arg5: memref<1x256xf32, #tpu.memory_space<vmem>>, %arg6: memref<1x256xf32, #tpu.memory_space<vmem>>, %arg7: memref<1x32xf32, #tpu.memory_space<vmem>>, %arg8: memref<1x32xf32, #tpu.memory_space<vmem>>) attributes {dimension_semantics = [#tpu.dimension_semantics<parallel>], iteration_bounds = array<i64: 1>, scalar_prefetch = 0 : i64, scratch_operands = 0 : i64, tpu.core_type = #tpu.core_type<tc>, window_params = [{transform_indices = @transform_0, window_bounds = array<i64: 1, 128>}, {pipeline_mode = #tpu.pipeline_mode<synchronous>, transform_indices = @transform_1, window_bounds = array<i64: 128, 256>}, {pipeline_mode = #tpu.pipeline_mode<synchronous>, transform_indices = @transform_2, window_bounds = array<i64: 256, 256>}, {pipeline_mode = #tpu.pipeline_mode<synchronous>, transform_indices = @transform_3, window_bounds = array<i64: 256, 32>}, {pipeline_mode = #tpu.pipeline_mode<synchronous>, transform_indices = @transform_4, window_bounds = array<i64: 1, 256>}, {pipeline_mode = #tpu.pipeline_mode<synchronous>, transform_indices = @transform_5, window_bounds = array<i64: 1, 256>}, {pipeline_mode = #tpu.pipeline_mode<synchronous>, transform_indices = @transform_6, window_bounds = array<i64: 1, 32>}, {transform_indices = @transform_7, window_bounds = array<i64: 1, 32>}]} {
    %c0 = arith.constant 0 : index
    %c0_0 = arith.constant 0 : index
    %0 = vector.load %arg1[%c0, %c0_0] : memref<1x128xf32, #tpu.memory_space<vmem>>, vector<1x128xf32>
    %1 = arith.truncf %0 : vector<1x128xf32> to vector<1x128xbf16>
    %c0_1 = arith.constant 0 : index
    %c0_2 = arith.constant 0 : index
    %2 = vector.load %arg2[%c0_1, %c0_2] : memref<128x256xbf16, #tpu.memory_space<vmem>>, vector<128x256xbf16>
    %cst = arith.constant dense<0.000000e+00> : vector<1x256xf32>
    %3 = tpu.matmul %1, %2, %cst {dimension_numbers = #tpu.dot_dimension_numbers<[1], [0], [0], [1], [0, 0, 1, 1], [], []>} : vector<1x128xbf16>, vector<128x256xbf16>, vector<1x256xf32> -> vector<1x256xf32>
    %c0_3 = arith.constant 0 : index
    %c0_4 = arith.constant 0 : index
    %4 = vector.load %arg5[%c0_3, %c0_4] : memref<1x256xf32, #tpu.memory_space<vmem>>, vector<1x256xf32>
    %5 = arith.addf %3, %4 : vector<1x256xf32>
    %cst_5 = arith.constant 0.000000e+00 : f32
    %6 = vector.broadcast %cst_5 : f32 to vector<1x256xf32>
    %7 = arith.maximumf %5, %6 : vector<1x256xf32>
    %8 = arith.truncf %7 : vector<1x256xf32> to vector<1x256xbf16>
    %c0_6 = arith.constant 0 : index
    %c0_7 = arith.constant 0 : index
    %9 = vector.load %arg3[%c0_6, %c0_7] : memref<256x256xbf16, #tpu.memory_space<vmem>>, vector<256x256xbf16>
    %cst_8 = arith.constant dense<0.000000e+00> : vector<1x256xf32>
    %10 = tpu.matmul %8, %9, %cst_8 {dimension_numbers = #tpu.dot_dimension_numbers<[1], [0], [0], [1], [0, 0, 1, 1], [], []>} : vector<1x256xbf16>, vector<256x256xbf16>, vector<1x256xf32> -> vector<1x256xf32>
    %c0_9 = arith.constant 0 : index
    %c0_10 = arith.constant 0 : index
    %11 = vector.load %arg6[%c0_9, %c0_10] : memref<1x256xf32, #tpu.memory_space<vmem>>, vector<1x256xf32>
    %12 = arith.addf %10, %11 : vector<1x256xf32>
    %cst_11 = arith.constant 0.000000e+00 : f32
    %13 = vector.broadcast %cst_11 : f32 to vector<1x256xf32>
    %14 = arith.maximumf %12, %13 : vector<1x256xf32>
    %15 = arith.truncf %14 : vector<1x256xf32> to vector<1x256xbf16>
    %c0_12 = arith.constant 0 : index
    %c0_13 = arith.constant 0 : index
    %16 = vector.load %arg4[%c0_12, %c0_13] : memref<256x32xbf16, #tpu.memory_space<vmem>>, vector<256x32xbf16>
    %cst_14 = arith.constant dense<0.000000e+00> : vector<1x32xf32>
    %17 = tpu.matmul %15, %16, %cst_14 {dimension_numbers = #tpu.dot_dimension_numbers<[1], [0], [0], [1], [0, 0, 1, 1], [], []>} : vector<1x256xbf16>, vector<256x32xbf16>, vector<1x32xf32> -> vector<1x32xf32>
    %c0_15 = arith.constant 0 : index
    %c0_16 = arith.constant 0 : index
    %18 = vector.load %arg7[%c0_15, %c0_16] : memref<1x32xf32, #tpu.memory_space<vmem>>, vector<1x32xf32>
    %19 = arith.addf %17, %18 : vector<1x32xf32>
    %c0_17 = arith.constant 0 : index
    %c0_18 = arith.constant 0 : index
    %20 = vector.load %arg8[%c0_17, %c0_18] : memref<1x32xf32, #tpu.memory_space<vmem>>, vector<1x32xf32>
    tpu.vector_store %arg8[%c0_17, %c0_18], %19 {strides = array<i32>} : memref<1x32xf32, #tpu.memory_space<vmem>>, vector<1x32xf32>,
    return
  }
  func.func @transform_0(%arg0: i32) -> (i32, i32) {
    %c0_i32 = arith.constant 0 : i32
    %c0_i32_0 = arith.constant 0 : i32
    return %arg0, %c0_i32 : i32, i32
  }
  func.func @transform_1(%arg0: i32) -> (i32, i32) {
    %c0_i32 = arith.constant 0 : i32
    %c0_i32_0 = arith.constant 0 : i32
    %c0_i32_1 = arith.constant 0 : i32
    return %c0_i32, %c0_i32_0 : i32, i32
  }
  func.func @transform_2(%arg0: i32) -> (i32, i32) {
    %c0_i32 = arith.constant 0 : i32
    %c0_i32_0 = arith.constant 0 : i32
    %c0_i32_1 = arith.constant 0 : i32
    return %c0_i32, %c0_i32_0 : i32, i32
  }
  func.func @transform_3(%arg0: i32) -> (i32, i32) {
    %c0_i32 = arith.constant 0 : i32
    %c0_i32_0 = arith.constant 0 : i32
    %c0_i32_1 = arith.constant 0 : i32
    return %c0_i32, %c0_i32_0 : i32, i32
  }
  func.func @transform_4(%arg0: i32) -> (i32, i32) {
    %c0_i32 = arith.constant 0 : i32
    %c0_i32_0 = arith.constant 0 : i32
    %c0_i32_1 = arith.constant 0 : i32
    return %c0_i32, %c0_i32_0 : i32, i32
  }
  func.func @transform_5(%arg0: i32) -> (i32, i32) {
    %c0_i32 = arith.constant 0 : i32
    %c0_i32_0 = arith.constant 0 : i32
    %c0_i32_1 = arith.constant 0 : i32
    return %c0_i32, %c0_i32_0 : i32, i32
  }
  func.func @transform_6(%arg0: i32) -> (i32, i32) {
    %c0_i32 = arith.constant 0 : i32
    %c0_i32_0 = arith.constant 0 : i32
    %c0_i32_1 = arith.constant 0 : i32
    return %c0_i32, %c0_i32_0 : i32, i32
  }
  func.func @transform_7(%arg0: i32) -> (i32, i32) {
    %c0_i32 = arith.constant 0 : i32
    %c0_i32_0 = arith.constant 0 : i32
    return %arg0, %c0_i32 : i32, i32
  }
}

</mosaic_0001>

<bundles_post_ra>
// kernel: tpu_custom_call.1
= control target key start
LH: loop header
LB: loop body
LE: loop exit
PB: predicated region body
PF: predicated region fallthrough
CT: control target
= control target key end

     0   :  { %12 = vsyncpa [#allocation3], 0  ;;  %s1036_s0 = inlined_call_operand.vmem [shape: f32[1,128], index: 0, kind: input, shape index: {}]   ;;  %s1037_s1 = inlined_call_operand.vmem [shape: bf16[128,256], index: 1, kind: input, shape index: {}]   ;;  %s1038_s2 = inlined_call_operand.hbm [shape: bf16[256,256], index: 2, kind: input, shape index: {}]   ;;  %s1039_s3 = inlined_call_operand.vmem [shape: bf16[256,32], index: 3, kind: input, shape index: {}]   ;;  %s1040_s4 = inlined_call_operand.vmem [shape: f32[1,256], index: 4, kind: input, shape index: {}]   ;;  %s1041_s5 = inlined_call_operand.vmem [shape: f32[1,256], index: 5, kind: input, shape index: {}]   ;;  %s1042_s6 = inlined_call_operand.vmem [shape: f32[1,32], index: 6, kind: input, shape index: {}]   ;;  %s1043_s7 = inlined_call_operand.hbm [shape: f32[1,32], index: 7, kind: output, shape index: {}]  }
   0x1   :  { %13 = vsyncpa [#allocation4], 0  ;;  %s859_s24 = smov [#allocation2]   ;;  %s811_s28 = scalar_lea.hbm %s1038_s2, 4096 }
   0x2   :  { %s23_s25 = sshll.u32 %s859_s24, 4  ;;  %p812_p0 = scmp.ne.s32.totalorder %s1038_s2, %s811_s28  ;;  %s24_s25 = int_to_ptr.vmem [resolvable:$true] %s23_s25 }
   0x3   :  { %p815_p1 = scmp.lt.u32.totalorder %s811_s28, %s1038_s2 }
   0x5   :  { %p817_p2 = pnand %p815_p1, %p812_p0 }
   0x7   :  { %820 = shalt.err (!%p817_p2)
}
   0x8   :  { %s821_s10 = scalar_lea.vmem %s24_s25, 4096  ;;  %p826_p4 = scmp.lt.s32.totalorder %s24_s25, %s24_s25 }
   0x9   :  { %p822_p3 = scmp.ne.s32.totalorder %s24_s25, %s821_s10  ;;  %p827_p5 = scmp.lt.s32.totalorder %s821_s10, %s821_s10 }
   0xb   :  { %p828_p6 = por %p827_p5, %p826_p4 }
   0xd   :  { %p829_p7 = pnand %p828_p6, %p822_p3 }
   0xf   :  { %832 = shalt.err (!%p829_p7)
}
  0x10   :  { %s860_s11 = smov 128   ;;  %s861_s12 = smov 8  }
  0x11   :  { %29 = dma.hbm_to_vmem [thread:$0]  %s1038_s2, 4096, %s24_s25, [#allocation3], %s860_s11, %s860_s11, %s861_s12  }
  0x12   :  { %855 = dma.done.wait [#allocation3], 4096  }
  0x13   :  { %856 = vsyncadd [#allocation3], 4294963200  ;;  %v862_v0 = vmov 0   ;;  %v723_v1 = vld [vmem:[%s1037_s1 + $0x4] ss:$8 sps:$4 sm:$0xff]   ;;  %v799_v55 = vld [vmem:[%s1039_s3 + $0x50] sm:$0xff]   ;;  %v142_v63 = vlaneseq }
  0x14   :  { %184 = vmatprep.mubr.bf16.mxu0 %v862_v0  ;;  %v725_v2 = vld [vmem:[%s1037_s1] ss:$8 sps:$4 sm:$0xff]   ;;  %152 = vmatprep.subr.bf16.mxu0 %v723_v1  ;;  %v726_v3 = vld [vmem:[%s1037_s1 + $0x14] ss:$8 sps:$4 sm:$0xff]   ;;  %v728_v4 = vld [vmem:[%s1037_s1 + $0x10] ss:$8 sps:$4 sm:$0xff]  }
  0x15   :  { %153 = vmatpush1.bf16.msra.mxu0 %v725_v2  ;;  %v729_v5 = vld [vmem:[%s1037_s1 + $0x24] ss:$8 sps:$4 sm:$0xff]   ;;  %v731_v6 = vld [vmem:[%s1037_s1 + $0x20] ss:$8 sps:$4 sm:$0xff]   ;;  %v732_v7 = vld [vmem:[%s1037_s1 + $0x34] ss:$8 sps:$4 sm:$0xff]  }
  0x16   :  { %154 = vmatprep.subr.bf16.mxu0 %v726_v3  ;;  %v734_v8 = vld [vmem:[%s1037_s1 + $0x30] ss:$8 sps:$4 sm:$0xff]   ;;  %v735_v9 = vld [vmem:[%s1037_s1 + $0x44] ss:$8 sps:$4 sm:$0xff]   ;;  %v749_v11 = vld [vmem:[#allocation2] ss:$8 sps:$4 sm:$0xff]  }
  0x17   :  { %v747_v10 = vld [vmem:[#allocation2 + $0x4] ss:$8 sps:$4 sm:$0xff]   ;;  %v750_v12 = vld [vmem:[#allocation2 + $0x14] ss:$8 sps:$4 sm:$0xff]   ;;  %v737_v13 = vld [vmem:[%s1037_s1 + $0x40] ss:$8 sps:$4 sm:$0xff]  }
  0x18   :  { %401 = vmatprep.subr.bf16.mxu1 %v747_v10  ;;  %v752_v14 = vld [vmem:[#allocation2 + $0x10] ss:$8 sps:$4 sm:$0xff]   ;;  %v753_v15 = vld [vmem:[#allocation2 + $0x24] ss:$8 sps:$4 sm:$0xff]   ;;  %v738_v16 = vld [vmem:[%s1037_s1 + $0x54] ss:$8 sps:$4 sm:$0xff]  }
  0x19   :  { %155 = vmatpush1.bf16.msra.mxu0 %v728_v4  ;;  %402 = vmatpush1.bf16.msra.mxu1 %v749_v11  ;;  %v740_v17 = vld [vmem:[%s1037_s1 + $0x50] ss:$8 sps:$4 sm:$0xff]   ;;  %v755_v18 = vld [vmem:[#allocation2 + $0x20] ss:$8 sps:$4 sm:$0xff]   ;;  %v756_v19 = vld [vmem:[#allocation2 + $0x34] ss:$8 sps:$4 sm:$0xff]  }
  0x1a   :  { %156 = vmatprep.subr.bf16.mxu0 %v729_v5  ;;  %403 = vmatprep.subr.bf16.mxu1 %v750_v12  ;;  %v741_v20 = vld [vmem:[%s1037_s1 + $0x64] ss:$8 sps:$4 sm:$0xff]   ;;  %v743_v21 = vld [vmem:[%s1037_s1 + $0x60] ss:$8 sps:$4 sm:$0xff]   ;;  %v758_v22 = vld [vmem:[#allocation2 + $0x30] ss:$8 sps:$4 sm:$0xff]  }
  0x1b   :  { %v759_v23 = vld [vmem:[#allocation2 + $0x44] ss:$8 sps:$4 sm:$0xff]   ;;  %v744_v24 = vld [vmem:[%s1037_s1 + $0x74] ss:$8 sps:$4 sm:$0xff]   ;;  %v746_v25 = vld [vmem:[%s1037_s1 + $0x70] ss:$8 sps:$4 sm:$0xff]  }
  0x1c   :  { %v42_v26 = vld [vmem:[%s1036_s0] sm:$0x1]  ;;  %v762_v28 = vld [vmem:[#allocation2 + $0x54] ss:$8 sps:$4 sm:$0xff]   ;;  %v764_v29 = vld [vmem:[#allocation2 + $0x50] ss:$8 sps:$4 sm:$0xff]  }
  0x1d   :  { %157 = vmatpush1.bf16.msra.mxu0 %v731_v6  ;;  %404 = vmatpush1.bf16.msra.mxu1 %v752_v14  ;;  %v761_v27 = vld [vmem:[#allocation2 + $0x40] ss:$8 sps:$4 sm:$0xff]   ;;  %v765_v30 = vld [vmem:[#allocation2 + $0x64] ss:$8 sps:$4 sm:$0xff]   ;;  %v43_v31 = vpack.c.bf16 %v42_v26, %v42_v26  ;;  %v768_v33 = vld [vmem:[#allocation2 + $0x74] ss:$8 sps:$4 sm:$0xff]  }
  0x1e   :  { %158 = vmatprep.subr.bf16.mxu0 %v732_v7  ;;  %405 = vmatprep.subr.bf16.mxu1 %v753_v15  ;;  %v767_v32 = vld [vmem:[#allocation2 + $0x60] ss:$8 sps:$4 sm:$0xff]   ;;  %v770_v34 = vld [vmem:[#allocation2 + $0x70] ss:$8 sps:$4 sm:$0xff]   ;;  %v771_v35 = vld [vmem:[#allocation2 + $0x84] ss:$8 sps:$4 sm:$0xff]  }
  0x1f   :  { %v773_v36 = vld [vmem:[#allocation2 + $0x80] ss:$8 sps:$4 sm:$0xff]   ;;  %v774_v37 = vld [vmem:[#allocation2 + $0x94] ss:$8 sps:$4 sm:$0xff]   ;;  %v776_v38 = vld [vmem:[#allocation2 + $0x90] ss:$8 sps:$4 sm:$0xff]  }
  0x20   :  { %v777_v39 = vld [vmem:[#allocation2 + $0xa4] ss:$8 sps:$4 sm:$0xff]   ;;  %v779_v40 = vld [vmem:[#allocation2 + $0xa0] ss:$8 sps:$4 sm:$0xff]   ;;  %v780_v41 = vld [vmem:[#allocation2 + $0xb4] ss:$8 sps:$4 sm:$0xff]  }
  0x21   :  { %159 = vmatpush1.bf16.msra.mxu0 %v734_v8  ;;  %406 = vmatpush1.bf16.msra.mxu1 %v755_v18  ;;  %v782_v42 = vld [vmem:[#allocation2 + $0xb0] ss:$8 sps:$4 sm:$0xff]   ;;  %v783_v43 = vld [vmem:[#allocation2 + $0xc4] ss:$8 sps:$4 sm:$0xff]   ;;  %v785_v44 = vld [vmem:[#allocation2 + $0xc0] ss:$8 sps:$4 sm:$0xff]  }
  0x22   :  { %160 = vmatprep.subr.bf16.mxu0 %v735_v9  ;;  %407 = vmatprep.subr.bf16.mxu1 %v756_v19  ;;  %v786_v45 = vld [vmem:[#allocation2 + $0xd4] ss:$8 sps:$4 sm:$0xff]   ;;  %v788_v46 = vld [vmem:[#allocation2 + $0xd0] ss:$8 sps:$4 sm:$0xff]   ;;  %v789_v47 = vld [vmem:[#allocation2 + $0xe4] ss:$8 sps:$4 sm:$0xff]  }
  0x23   :  { %v791_v48 = vld [vmem:[#allocation2 + $0xe0] ss:$8 sps:$4 sm:$0xff]   ;;  %v792_v49 = vld [vmem:[#allocation2 + $0xf4] ss:$8 sps:$4 sm:$0xff]   ;;  %v794_v50 = vld [vmem:[#allocation2 + $0xf0] ss:$8 sps:$4 sm:$0xff]  }
  0x24   :  { %v795_v51 = vld [vmem:[%s1039_s3 + $0x40] sm:$0xff]   ;;  %v797_v53 = vld [vmem:[%s1039_s3 + $0x48] sm:$0xff]   ;;  %v800_v56 = vld [vmem:[%s1039_s3 + $0x10] sm:$0xff]   ;;  %v143_v0 = vshrl.u32 %v142_v63, 7  ;;  %vm615_vm0 = vcmask 253952  }
  0x25   :  { %161 = vmatpush1.bf16.msra.mxu0 %v737_v13  ;;  %408 = vmatpush1.bf16.msra.mxu1 %v758_v22  ;;  %v796_v52 = vld [vmem:[%s1039_s3] sm:$0xff]   ;;  %v798_v54 = vld [vmem:[%s1039_s3 + $0x8] sm:$0xff]   ;;  %v801_v57 = vld [vmem:[%s1039_s3 + $0x58] sm:$0xff]  }
  0x26   :  { %162 = vmatprep.subr.bf16.mxu0 %v738_v16  ;;  %409 = vmatprep.subr.bf16.mxu1 %v759_v23  ;;  %v802_v58 = vld [vmem:[%s1039_s3 + $0x18] sm:$0xff]   ;;  %v803_v59 = vld [vmem:[%s1039_s3 + $0x60] sm:$0xff]   ;;  %v805_v61 = vld [vmem:[%s1039_s3 + $0x68] sm:$0xff]   ;;  %v144_v1 = vsub.s32 0, %v143_v0  ;;  %v148_v3 = vsub.s32 1, %v143_v0 }
  0x27   :  { %v804_v60 = vld [vmem:[%s1039_s3 + $0x20] sm:$0xff]   ;;  %v806_v62 = vld [vmem:[%s1039_s3 + $0x28] sm:$0xff]   ;;  %v807_v16 = vld [vmem:[%s1039_s3 + $0x70] sm:$0xff]  }
  0x28   :  { %v60_v2 = vld [vmem:[%s1040_s4] sm:$0x3]  ;;  %v809_v18 = vld [vmem:[%s1039_s3 + $0x78] sm:$0xff]  }
  0x29   :  { %163 = vmatpush1.bf16.msra.mxu0 %v740_v17  ;;  %410 = vmatpush1.bf16.msra.mxu1 %v761_v27  ;;  %v145_v4 = vrot.slane %v60_v2, %v144_v1  ;;  %v149_v5 = vrot.slane %v60_v2, %v148_v3  ;;  %v808_v17 = vld [vmem:[%s1039_s3 + $0x30] sm:$0xff]   ;;  %v810_v19 = vld [vmem:[%s1039_s3 + $0x38] sm:$0xff]  }
  0x2a   :  { %164 = vmatprep.subr.bf16.mxu0 %v741_v20  ;;  %411 = vmatprep.subr.bf16.mxu1 %v762_v28  ;;  %v229_v20 = vld [vmem:[%s1041_s5] sm:$0x3]  ;;  %s863_s5 = smov [#allocation5]  }
  0x2b   :  { %v398_v22 = vrot.slane %v229_v20, %v148_v3  ;;  %s623_s9 = sshll.u32 %s863_s5, 4  ;;  %s624_s9 = int_to_ptr.vmem [resolvable:$true] %s623_s9 }
  0x2c   :  { %s833_s10 = scalar_lea.vmem %s624_s9, 16  ;;  %s837_s11 = scalar_lea.vmem %s624_s9, 32 }
  0x2d   :  { %165 = vmatpush1.bf16.msra.mxu0 %v743_v21  ;;  %412 = vmatpush1.bf16.msra.mxu1 %v764_v29  ;;  %v394_v21 = vrot.slane %v229_v20, %v144_v1  ;;  %p834_p8 = scmp.ne.s32.totalorder %s624_s9, %s833_s10  ;;  %p838_p9 = scmp.lt.s32.totalorder %s624_s9, %s624_s9 }
  0x2e   :  { %166 = vmatprep.subr.bf16.mxu0 %v744_v24  ;;  %413 = vmatprep.subr.bf16.mxu1 %v765_v30  ;;  %p839_p10 = scmp.lt.s32.totalorder %s837_s11, %s833_s10 }
  0x30   :  { %p840_p11 = por %p839_p10, %p838_p9 }
  0x31   :  { %167 = vmatpush1.bf16.msra.mxu0 %v746_v25  ;;  %414 = vmatpush1.bf16.msra.mxu1 %v767_v32 }
  0x32   :  { %415 = vmatprep.subr.bf16.mxu1 %v768_v33  ;;  %696 = vmatprep.subr.bf16.mxu0 %v795_v51  ;;  %p841_p12 = pnand %p840_p11, %p834_p8 }
  0x34   :  { %185 = vmatmul.mubr.bf16.vlgmr.msra.gmra.mrb[0].mxu0 %v43_v31 }
  0x35   :  { %416 = vmatpush1.bf16.msra.mxu1 %v770_v34  ;;  %697 = vmatpush3.bf16.msra.mxu0 %v796_v52  ;;  %v478_v34 = vld [vmem:[%s1042_s6] sm:$0x1] }
  0x36   :  { %417 = vmatprep.subr.bf16.mxu1 %v771_v35  ;;  %698 = vmatprep.subr.bf16.mxu0 %v797_v53 }
  0x39   :  { %418 = vmatpush1.bf16.msra.mxu1 %v773_v36  ;;  %699 = vmatpush3.bf16.msra.mxu0 %v798_v54 }
  0x3a   :  { %419 = vmatprep.subr.bf16.mxu1 %v774_v37  ;;  %700 = vmatprep.subr.bf16.mxu0 %v799_v55 }
  0x3d   :  { %420 = vmatpush1.bf16.msra.mxu1 %v776_v38  ;;  %701 = vmatpush3.bf16.msra.mxu0 %v800_v56 }
  0x3e   :  { %421 = vmatprep.subr.bf16.mxu1 %v777_v39  ;;  %702 = vmatprep.subr.bf16.mxu0 %v801_v57 }
  0x41   :  { %422 = vmatpush1.bf16.msra.mxu1 %v779_v40  ;;  %703 = vmatpush3.bf16.msra.mxu0 %v802_v58 }
  0x42   :  { %423 = vmatprep.subr.bf16.mxu1 %v780_v41  ;;  %704 = vmatprep.subr.bf16.mxu0 %v803_v59 }
  0x45   :  { %424 = vmatpush1.bf16.msra.mxu1 %v782_v42  ;;  %705 = vmatpush3.bf16.msra.mxu0 %v804_v60 }
  0x46   :  { %425 = vmatprep.subr.bf16.mxu1 %v783_v43  ;;  %706 = vmatprep.subr.bf16.mxu0 %v805_v61 }
  0x49   :  { %426 = vmatpush1.bf16.msra.mxu1 %v785_v44  ;;  %707 = vmatpush3.bf16.msra.mxu0 %v806_v62 }
  0x4a   :  { %427 = vmatprep.subr.bf16.mxu1 %v786_v45  ;;  %708 = vmatprep.subr.bf16.mxu0 %v807_v16 }
  0x4d   :  { %428 = vmatpush1.bf16.msra.mxu1 %v788_v46  ;;  %709 = vmatpush3.bf16.msra.mxu0 %v808_v17 }
  0x4e   :  { %429 = vmatprep.subr.bf16.mxu1 %v789_v47  ;;  %710 = vmatprep.subr.bf16.mxu0 %v809_v18 }
  0x51   :  { %430 = vmatpush1.bf16.msra.mxu1 %v791_v48  ;;  %711 = vmatpush3.bf16.msra.mxu0 %v810_v19 }
  0x52   :  { %431 = vmatprep.subr.bf16.mxu1 %v792_v49 }
  0x55   :  { %432 = vmatpush1.bf16.msra.mxu1 %v794_v50 }
 0x107   :  { %v186_v6 = vpop.f32.mrb[0].mxu0 }
 0x108   :  { %v187_v7 = vadd.f32 %v186_v6, %v145_v4  ;;  %v188_v8 = vpop.f32.mrb[1].mxu0 }
 0x109   :  { %v189_v9 = vadd.f32 %v188_v8, %v149_v5  ;;  %v190_v10 = vpop.f32.mrb[2].mxu0 }
 0x10a   :  { %v193_v11 = vmax.f32 %v187_v7, 0.0  ;;  %v191_v12 = vpop.f32.mrb[3].mxu0 }
 0x10b   :  { %v194_v13 = vmax.f32 %v189_v9, 0.0 }
 0x10c   :  { %v195_v15 = vpack.c.bf16 %v193_v11, %v193_v11 }
 0x10d   :  { %v196_v14 = vpack.c.bf16 %v194_v13, %v194_v13 }
 0x10f   :  { %433 = vmatprep.mubr.bf16.mxu1 %v196_v14 }
 0x110   :  { %434 = vmatmul.mubr.bf16.vlgmr.msra.gmra.mrb[0].mxu1 %v195_v15 }
 0x1e3   :  { %v435_v23 = vpop.f32.mrb[0].mxu1 }
 0x1e4   :  { %v436_v24 = vadd.f32 %v435_v23, %v394_v21  ;;  %v437_v25 = vpop.f32.mrb[1].mxu1 }
 0x1e5   :  { %v438_v26 = vadd.f32 %v437_v25, %v398_v22  ;;  %v439_v27 = vpop.f32.mrb[2].mxu1 }
 0x1e6   :  { %v442_v28 = vmax.f32 %v436_v24, 0.0  ;;  %v440_v29 = vpop.f32.mrb[3].mxu1 }
 0x1e7   :  { %v443_v30 = vmax.f32 %v438_v26, 0.0 }
 0x1e8   :  { %v444_v32 = vpack.c.bf16 %v442_v28, %v442_v28 }
 0x1e9   :  { %v445_v31 = vpack.c.bf16 %v443_v30, %v443_v30 }
 0x1eb   :  { %607 = vmatprep.mubr.bf16.mxu0 %v445_v31 }
 0x1ec   :  { %608 = vmatmul.mubr.bf16.vlgmr.msra.gmra.mrb[4].mxu0 %v444_v32 }
 0x2bf   :  { %v712_v33 = vpop.f32.mrb[4].mxu0 }
 0x2c0   :  { %v713_v35 = vpop.f32.mrb[5].mxu0 }
 0x2c1   :  { %v714_v36 = vadd.f32 %v713_v35, %v712_v33  ;;  %v715_v37 = vpop.f32.mrb[6].mxu0 }
 0x2c2   :  { %v716_v38 = vpop.f32.mrb[7].mxu0 }
 0x2c3   :  { %v610_v39 = vadd.f32 %v714_v36, %v478_v34 }
 0x2c5   :  { %616 = vst.msk [vmem:[#allocation5] sm:$0x1] %vm615_vm0, %v610_v39 }
 0x2c6   :  { %844 = shalt.err (!%p841_p12)
}
 0x2c7   :  { %s845_s13 = scalar_lea.hbm %s1043_s7, 16 }
 0x2c8   :  { %p846_p13 = scmp.ne.s32.totalorder %s1043_s7, %s845_s13  ;;  %p849_p0 = scmp.lt.u32.totalorder %s845_s13, %s1043_s7 }
 0x2ca   :  { %p851_p1 = pnand %p849_p0, %p846_p13 }
 0x2cc   :  { %854 = shalt.err (!%p851_p1)
}
 0x2cd   :  { %626 = dma.vmem_to_hbm [thread:$0]  %s624_s9, 16, %s1043_s7, [#allocation4]  }
 0x2ce   :  { %857 = dma.done.wait [#allocation4], 16  }
 0x2cf   :  { %858 = vsyncadd [#allocation4], 4294967280 }
 0x2d0   :  { %630 = vsyncpa [#allocation3], 1 }
 0x2d1   :  { %631 = vsyncpa [#allocation4], 1 }

</bundles_post_ra>
